<compile_context>
chip_gen: v5e
topology: v5e:2x2
jax: 0.10.0
libtpu: 0.0.40
codegen_flags: <defaults>
</compile_context>

<pallas_src>
import jax
import jax.numpy as jnp
from jax.experimental import pallas as pl
from jax.experimental.pallas import tpu as pltpu


_MAX_BLOCK_ELEMS = 128 * 1024   # 512 KiB of f32 per (rows, lane) operand block


def _edf_update_kernel(coef_ref,   # SMEM (2,): [1 - rho, rho * (N / batch_size)]
                       hat_ref,    # VMEM (2, br, lane): stacked {cc_hat, ct_hat}
                       cc_ref,     # VMEM (br, lane): countClass_batch block
                       ct_ref,     # VMEM (br, lane): countTotal_batch block
                       out_ref):   # VMEM (2, br, lane): aliased with hat state
    a = coef_ref[0]                # 1 - rho
    b = coef_ref[1]                # rho * (N / batch_size)
    # Hot path: fused elementwise EMA on the VPU, lane-dense, unmasked stores.
    out_ref[0] = a * hat_ref[0] + b * cc_ref[...]
    out_ref[1] = a * hat_ref[1] + b * ct_ref[...]


def _round_up(x, m):
    return (x + m - 1) // m * m


def _pick_lane(padded_total):
    """Widest lane dim (multiple of 128) dividing the padded flat size."""
    for lane in (1024, 512, 256, 128):
        if padded_total % lane == 0:
            return lane
    return 128  # unreachable: padded_total is always a multiple of 128


def _row_tiling(rows, lane):
    """Pick (block_rows, num_row_blocks) so each operand block is ~<=512 KiB."""
    max_rows = max(_MAX_BLOCK_ELEMS // lane, 8)
    if rows <= max_rows:
        return rows, 1
    cand = (max_rows // 8) * 8
    br = cand
    while cand >= 8:
        if rows % cand == 0:
            return cand, rows // cand
        cand -= 8
    # No clean divisor: padded tail block (elementwise-safe; stores are masked
    # only on the final partial block).
    return br, pl.cdiv(rows, br)


def _edf_update_impl(state, cc_batch, ct_batch, rho, scale):
    _, rows, lane = state.shape
    f32 = jnp.float32
    total = cc_batch.size
    pad = rows * lane - total

    cc_flat = cc_batch.astype(f32).reshape(-1)
    ct_flat = ct_batch.astype(f32).reshape(-1)
    if pad:
        cc_flat = jnp.pad(cc_flat, (0, pad))
        ct_flat = jnp.pad(ct_flat, (0, pad))
    cc_b = cc_flat.reshape(rows, lane)
    ct_b = ct_flat.reshape(rows, lane)

    # Coefficients computed on-device inside the jit (no per-step host array).
    coefs = jnp.stack([1.0 - rho, rho * scale]).astype(f32)

    block_rows, grid_r = _row_tiling(rows, lane)

    return pl.pallas_call(
        _edf_update_kernel,
        out_shape=jax.ShapeDtypeStruct((2, rows, lane), f32),
        grid=(grid_r,),
        in_specs=[
            pl.BlockSpec(memory_space=pltpu.MemorySpace.SMEM),
            pl.BlockSpec((2, block_rows, lane), lambda i: (0, i, 0)),
            pl.BlockSpec((block_rows, lane), lambda i: (i, 0)),
            pl.BlockSpec((block_rows, lane), lambda i: (i, 0)),
        ],
        out_specs=pl.BlockSpec((2, block_rows, lane), lambda i: (0, i, 0)),
        # In-place EMA: the persistent stacked hat slab (input 1) is aliased
        # with the output and donated by the jit wrapper below.
        input_output_aliases={1: 0},
        compiler_params=pltpu.CompilerParams(
            dimension_semantics=("parallel",)),
    )(coefs, state, cc_b, ct_b)


_edf_update_jit = jax.jit(_edf_update_impl, donate_argnums=(0,))


class StochasticEDFModel:
    """JAX/Pallas mirror of the PyTorch stochasticEDFModel."""

    def __init__(self, no_of_groups, latent_size, N, batch_size):
        self.no_of_groups = no_of_groups
        self.latent_size = latent_size
        self._total = no_of_groups * latent_size
        padded = _round_up(self._total, 128)
        lane = _pick_lane(padded)
        rows = padded // lane
        # Deterministic init exactly as in the PyTorch __init__, stacked once
        # into the persistent lane-dense (2, rows, lane) state slab.
        cc0 = jnp.full((padded,), N / (batch_size * no_of_groups), jnp.float32)
        ct0 = jnp.full((padded,), N / batch_size, jnp.float32)
        self._state = jnp.stack([cc0, ct0], axis=0).reshape(2, rows, lane)

    @property
    def countClass_hat(self):
        flat = self._state[0].reshape(-1)[: self._total]
        return flat.reshape(self.no_of_groups, self.latent_size)

    @property
    def countTotal_hat(self):
        flat = self._state[1].reshape(-1)[: self._total]
        return flat.reshape(self.no_of_groups, self.latent_size)

    def forward(self, rho, countClass_batch, countTotal_batch, N, batch_size):
        self._state = _edf_update_jit(
            self._state,
            countClass_batch,
            countTotal_batch,
            jnp.float32(rho),
            jnp.float32(N / batch_size),
        )
        return self.countClass_hat, self.countTotal_hat


def _reference_step(cc_hat, ct_hat, cc_b, ct_b, rho, N, batch_size):
    scale = N / batch_size
    cc = (1 - rho) * cc_hat + rho * scale * cc_b
    ct = (1 - rho) * ct_hat + rho * scale * ct_b
    return cc, ct


if __name__ == "__main__":
    no_of_groups = 4
    latent_size = 32
    N = 1000
    batch_size = 8
    rho = 0.1

    key = jax.random.PRNGKey(0)
    k1, k2, k3, k4 = jax.random.split(key, 4)
    cc_batch = jax.random.uniform(k1, (no_of_groups, latent_size), jnp.float32)
    ct_batch = jax.random.uniform(k2, (no_of_groups, latent_size), jnp.float32)

    model = StochasticEDFModel(no_of_groups, latent_size, N, batch_size)
    cc1, ct1 = model.forward(rho, cc_batch, ct_batch, N, batch_size)
    jax.block_until_ready((cc1, ct1))

    # Reference (plain JAX, same math as the PyTorch forward).
    cc_init = jnp.ones((no_of_groups, latent_size), jnp.float32) * (
        N / (batch_size * no_of_groups))
    ct_init = jnp.ones((no_of_groups, latent_size), jnp.float32) * (N / batch_size)
    cc_ref, ct_ref = _reference_step(cc_init, ct_init, cc_batch, ct_batch,
                                     rho, N, batch_size)
    assert jnp.allclose(cc1, cc_ref, rtol=1e-6, atol=1e-5)
    assert jnp.allclose(ct1, ct_ref, rtol=1e-6, atol=1e-5)

    # Second step exercises the stateful in-place EMA path (aliased/donated).
    cc2, ct2 = model.forward(rho, cc_batch, ct_batch, N, batch_size)
    jax.block_until_ready((cc2, ct2))
    cc_ref2, ct_ref2 = _reference_step(cc_ref, ct_ref, cc_batch, ct_batch,
                                       rho, N, batch_size)
    assert jnp.allclose(cc2, cc_ref2, rtol=1e-6, atol=1e-5)
    assert jnp.allclose(ct2, ct_ref2, rtol=1e-6, atol=1e-5)

    # Non-multiple-of-128 case exercises the lane-dense padding fallback.
    g2, l2 = 3, 20
    cc_b2 = jax.random.uniform(k3, (g2, l2), jnp.float32)
    ct_b2 = jax.random.uniform(k4, (g2, l2), jnp.float32)
    model2 = StochasticEDFModel(g2, l2, N, batch_size)
    cc3, ct3 = model2.forward(rho, cc_b2, ct_b2, N, batch_size)
    jax.block_until_ready((cc3, ct3))
    cc_init2 = jnp.ones((g2, l2), jnp.float32) * (N / (batch_size * g2))
    ct_init2 = jnp.ones((g2, l2), jnp.float32) * (N / batch_size)
    cc_ref3, ct_ref3 = _reference_step(cc_init2, ct_init2, cc_b2, ct_b2,
                                       rho, N, batch_size)
    assert jnp.allclose(cc3, cc_ref3, rtol=1e-6, atol=1e-5)
    assert jnp.allclose(ct3, ct_ref3, rtol=1e-6, atol=1e-5)

    print("KERNEL_OK")
</pallas_src>

<mosaic_0001>
module attributes {stable_mosaic.version = 11 : i64} {
  func.func @_edf_update_kernel(%arg0: i32, %arg1: memref<2xf32, #tpu.memory_space<smem>>, %arg2: memref<2x1x128xf32, #tpu.memory_space<vmem>>, %arg3: memref<1x128xf32, #tpu.memory_space<vmem>>, %arg4: memref<1x128xf32, #tpu.memory_space<vmem>>, %arg5: memref<2x1x128xf32, #tpu.memory_space<vmem>>) attributes {dimension_semantics = [#tpu.dimension_semantics<parallel>], iteration_bounds = array<i64: 1>, scalar_prefetch = 0 : i64, scratch_operands = 0 : i64, tpu.core_type = #tpu.core_type<tc>, window_params = [{transform_indices = @transform_0, window_bounds = array<i64: 2>}, {transform_indices = @transform_1, window_bounds = array<i64: 2, 1, 128>}, {transform_indices = @transform_2, window_bounds = array<i64: 1, 128>}, {transform_indices = @transform_3, window_bounds = array<i64: 1, 128>}, {transform_indices = @transform_4, window_bounds = array<i64: 2, 1, 128>}]} {
    %c0 = arith.constant 0 : index
    %0 = memref.load %arg1[%c0] : memref<2xf32, #tpu.memory_space<smem>>
    %c1 = arith.constant 1 : index
    %1 = memref.load %arg1[%c1] : memref<2xf32, #tpu.memory_space<smem>>
    %c0_0 = arith.constant 0 : index
    %c0_1 = arith.constant 0 : index
    %c0_2 = arith.constant 0 : index
    %2 = vector.load %arg2[%c0_0, %c0_1, %c0_2] : memref<2x1x128xf32, #tpu.memory_space<vmem>>, vector<1x1x128xf32>
    %3 = vector.shape_cast %2 : vector<1x1x128xf32> to vector<1x128xf32>
    %4 = vector.broadcast %0 : f32 to vector<1x128xf32>
    %5 = arith.mulf %4, %3 : vector<1x128xf32>
    %c0_3 = arith.constant 0 : index
    %c0_4 = arith.constant 0 : index
    %6 = vector.load %arg3[%c0_3, %c0_4] : memref<1x128xf32, #tpu.memory_space<vmem>>, vector<1x128xf32>
    %7 = vector.broadcast %1 : f32 to vector<1x128xf32>
    %8 = arith.mulf %7, %6 : vector<1x128xf32>
    %9 = arith.addf %5, %8 : vector<1x128xf32>
    %c0_5 = arith.constant 0 : index
    %c0_6 = arith.constant 0 : index
    %c0_7 = arith.constant 0 : index
    %10 = vector.load %arg5[%c0_5, %c0_6, %c0_7] : memref<2x1x128xf32, #tpu.memory_space<vmem>>, vector<1x1x128xf32>
    %11 = vector.shape_cast %10 : vector<1x1x128xf32> to vector<1x128xf32>
    %12 = vector.shape_cast %9 : vector<1x128xf32> to vector<1x1x128xf32>
    tpu.vector_store %arg5[%c0_5, %c0_6, %c0_7], %12 {strides = array<i32>} : memref<2x1x128xf32, #tpu.memory_space<vmem>>, vector<1x1x128xf32>,
    %c1_8 = arith.constant 1 : index
    %c0_9 = arith.constant 0 : index
    %c0_10 = arith.constant 0 : index
    %13 = vector.load %arg2[%c1_8, %c0_9, %c0_10] : memref<2x1x128xf32, #tpu.memory_space<vmem>>, vector<1x1x128xf32>
    %14 = vector.shape_cast %13 : vector<1x1x128xf32> to vector<1x128xf32>
    %15 = vector.broadcast %0 : f32 to vector<1x128xf32>
    %16 = arith.mulf %15, %14 : vector<1x128xf32>
    %c0_11 = arith.constant 0 : index
    %c0_12 = arith.constant 0 : index
    %17 = vector.load %arg4[%c0_11, %c0_12] : memref<1x128xf32, #tpu.memory_space<vmem>>, vector<1x128xf32>
    %18 = vector.broadcast %1 : f32 to vector<1x128xf32>
    %19 = arith.mulf %18, %17 : vector<1x128xf32>
    %20 = arith.addf %16, %19 : vector<1x128xf32>
    %c1_13 = arith.constant 1 : index
    %c0_14 = arith.constant 0 : index
    %c0_15 = arith.constant 0 : index
    %21 = vector.load %arg5[%c1_13, %c0_14, %c0_15] : memref<2x1x128xf32, #tpu.memory_space<vmem>>, vector<1x1x128xf32>
    %22 = vector.shape_cast %21 : vector<1x1x128xf32> to vector<1x128xf32>
    %23 = vector.shape_cast %20 : vector<1x128xf32> to vector<1x1x128xf32>
    tpu.vector_store %arg5[%c1_13, %c0_14, %c0_15], %23 {strides = array<i32>} : memref<2x1x128xf32, #tpu.memory_space<vmem>>, vector<1x1x128xf32>,
    return
  }
  func.func @transform_0(%arg0: i32) -> i32 {
    %c0_i32 = arith.constant 0 : i32
    %c0_i32_0 = arith.constant 0 : i32
    return %c0_i32 : i32
  }
  func.func @transform_1(%arg0: i32) -> (i32, i32, i32) {
    %c0_i32 = arith.constant 0 : i32
    %c0_i32_0 = arith.constant 0 : i32
    %c0_i32_1 = arith.constant 0 : i32
    return %c0_i32, %arg0, %c0_i32_0 : i32, i32, i32
  }
  func.func @transform_2(%arg0: i32) -> (i32, i32) {
    %c0_i32 = arith.constant 0 : i32
    %c0_i32_0 = arith.constant 0 : i32
    return %arg0, %c0_i32 : i32, i32
  }
  func.func @transform_3(%arg0: i32) -> (i32, i32) {
    %c0_i32 = arith.constant 0 : i32
    %c0_i32_0 = arith.constant 0 : i32
    return %arg0, %c0_i32 : i32, i32
  }
  func.func @transform_4(%arg0: i32) -> (i32, i32, i32) {
    %c0_i32 = arith.constant 0 : i32
    %c0_i32_0 = arith.constant 0 : i32
    %c0_i32_1 = arith.constant 0 : i32
    return %c0_i32, %arg0, %c0_i32_0 : i32, i32, i32
  }
}

</mosaic_0001>

<bundles_post_ra>
// kernel: _edf_update_impl.1
= control target key start
LH: loop header
LB: loop body
LE: loop exit
PB: predicated region body
PF: predicated region fallthrough
CT: control target
= control target key end

     0   :  { %9 = vsyncpa [#allocation5], 0  ;;  %s208_s0 = inlined_call_operand.vmem [shape: f32[2], index: 0, kind: input, shape index: {}]   ;;  %s209_s1 = inlined_call_operand.hbm [shape: f32[2,1,128], index: 1, kind: input, shape index: {}, may-alias: {1,4}]   ;;  %s210_s2 = inlined_call_operand.vmem [shape: f32[1,128], index: 2, kind: input, shape index: {}]   ;;  %s211_s3 = inlined_call_operand.vmem [shape: f32[1,128], index: 3, kind: input, shape index: {}]   ;;  %s212_s4 = inlined_call_operand.hbm [shape: f32[2,1,128], index: 4, kind: output, shape index: {}, may-alias: {1,4}]  }
   0x1   :  { %10 = vsyncpa [#allocation3], 0 }
   0x2   :  { %11 = vsyncpa [#allocation4], 0  ;;  %s17_s17 = sshll.u32 %s208_s0, 4  ;;  %s25_s20 = sshll.u32 %s209_s1, 4  ;;  %s18_s17 = int_to_ptr.vmem [resolvable:$true] %s17_s17  ;;  %s26_s20 = int_to_ptr.hbm [resolvable:$true] %s25_s20 }
   0x3   :  { %s157_s21 = smov [#allocation2]   ;;  %s158_s22 = smov [#allocation6]  }
   0x4   :  { %20 = dma.vmem_to_smem %s18_s17, 16, %s157_s21, [#allocation5]  }
   0x5   :  { %s27_s23 = sshll.u32 %s158_s22, 4  ;;  %s159_s24 = smov 16   ;;  %s28_s23 = int_to_ptr.vmem [resolvable:$true] %s27_s23 }
   0x6   :  { %s160_s25 = smov 1  }
   0x7   :  { %33 = dma.hbm_to_vmem [thread:$0]  %s26_s20, 32, %s28_s23, [#allocation3], %s159_s24, %s159_s24, %s160_s25  }
   0x8   :  { %151 = dma.done.wait [#allocation5], 16  }
   0x9   :  { %152 = vsyncadd [#allocation5], 4294967280 }
   0xa   :  { %153 = dma.done.wait [#allocation3], 32  }
   0xb   :  { %154 = vsyncadd [#allocation3], 4294967264 }
   0xc   :  { %46 = sfence }
   0xd   :  { %s47_s0 = sld [smem:[#allocation2]]  ;;  %v49_v0 = vld [vmem:[#allocation6] sm:$0x1]  ;;  %v58_v1 = vld [vmem:[#allocation6 + $0x1] sm:$0x1]  ;;  %s161_s30 = smov [#allocation7]  }
   0xe   :  { %s85_s26 = sld [smem:[#allocation2 + $0x1]]  ;;  %v52_v2 = vld [vmem:[%s210_s2] sm:$0x1]  ;;  %s69_s5 = sshll.u32 %s161_s30, 4  ;;  %s70_s5 = int_to_ptr.vmem [resolvable:$true] %s69_s5 }
   0xf   :  { %v60_v3 = vld [vmem:[%s211_s3] sm:$0x1]  ;;  %s71_s8 = sshll.u32 %s212_s4, 4  ;;  %s72_s8 = int_to_ptr.hbm [resolvable:$true] %s71_s8 }
  0x13   :  { %v50_v4 = vstv %s47_s0 }
  0x14   :  { %v51_v5 = vmul.f32 %v50_v4, %v49_v0  ;;  %v53_v6 = vstv %s85_s26  ;;  %v59_v7 = vmul.f32 %v58_v1, %v50_v4 }
  0x15   :  { %v54_v8 = vmul.f32 %v53_v6, %v52_v2  ;;  %v61_v9 = vmul.f32 %v60_v3, %v53_v6 }
  0x17   :  { %v55_v10 = vadd.f32 %v54_v8, %v51_v5  ;;  %v62_v11 = vadd.f32 %v61_v9, %v59_v7 }
  0x19   :  { %56 = vst [vmem:[#allocation7] sm:$0x1] %v55_v10 }
  0x1a   :  { %64 = vst [vmem:[#allocation7 + $0x1] sm:$0x1] %v62_v11 }
  0x1b   :  { %77 = dma.vmem_to_hbm [thread:$0]  %s70_s5, 32, %s72_s8, [#allocation4], %s159_s24, %s159_s24, %s160_s25  }
  0x1c   :  { %155 = dma.done.wait [#allocation4], 32  }
  0x1d   :  { %156 = vsyncadd [#allocation4], 4294967264 }
  0x1e   :  { %82 = vsyncpa [#allocation3], 1 }
  0x1f   :  { %83 = vsyncpa [#allocation4], 1 }
  0x20   :  { %84 = vsyncpa [#allocation5], 1 }

</bundles_post_ra>
